<compile_context>
chip_gen: v6e
topology: v6e:2x2x1
jax: 0.10.0
libtpu: 0.0.40
codegen_flags: <defaults>
</compile_context>

<pallas_src>
import functools

import jax
import jax.numpy as jnp
from jax.experimental import pallas as pl
from jax.experimental.pallas import tpu as pltpu


def _smoothnet_loss_kernel(d_ref, g_ref, out_ref, *, seq_len, channels,
                           pos_scale, accel_scale):
    """One (tb, L*C) tile: accumulate the weighted partial loss into out_ref."""
    lc = seq_len * channels

    @pl.when(pl.program_id(0) == 0)
    def _init():
        out_ref[0, 0] = jnp.float32(0.0)

    # Single error tensor; both loss terms are linear in (denoise - gt).
    e = d_ref[...].astype(jnp.float32) - g_ref[...].astype(jnp.float32)

    # Position L1 term.
    sum_pos = jnp.sum(jnp.abs(e))

    # Second difference along L as a repeated first difference on the
    # lane-flattened (L*C) axis: a one-timestep shift is a cyclic lane roll
    # by C (positive-shift form of roll(e, -C)), so
    #   d1[i]    = e[i]  - e[i + C]
    #   accel[i] = d1[i] - d1[i + C] = e[i] - 2*e[i + C] + e[i + 2C].
    d1 = e - pltpu.roll(e, shift=lc - channels, axis=1)
    accel = d1 - pltpu.roll(d1, shift=lc - channels, axis=1)
    # The last two timesteps wrap around -> mask them out of the reduction.
    lane = jax.lax.broadcasted_iota(jnp.int32, e.shape, 1)
    valid = lane < (seq_len - 2) * channels
    sum_accel = jnp.sum(jnp.where(valid, jnp.abs(accel), 0.0))

    out_ref[0, 0] += (jnp.float32(pos_scale) * sum_pos
                      + jnp.float32(accel_scale) * sum_accel)


def _choose_batch_tile(batch, bytes_per_row, budget_bytes=2 << 20):
    """Largest divisor of `batch` whose input tile fits the per-input VMEM
    budget, preferring sublane-aligned tiles (multiple of 8, or the full
    batch dim)."""
    divisors = [t for t in range(1, batch + 1) if batch % t == 0]
    fitting = [t for t in divisors if t * bytes_per_row <= budget_bytes]
    if not fitting:
        # Extremely long rows: whole batch per block; vmem_limit is raised.
        # TODO(synk): split very long rows along L (with 2-step halo) instead.
        return batch
    aligned = [t for t in fitting if t % 8 == 0 or t == batch]
    return max(aligned) if aligned else max(fitting)


def smoothnet_loss(denoise, gt, *, w_accel, w_pos):
    """Pallas TPU implementation of SmoothNetLoss.forward.

    denoise, gt: (B, L, C) arrays (f32 or bf16). Returns a scalar float32 loss.
    """
    assert denoise.shape == gt.shape
    B, L, C = denoise.shape
    assert L >= 3, "need at least 3 timesteps for the acceleration term"

    n_pos = B * L * C            # 'mean' denominator for loss_pos
    n_accel = B * (L - 2) * C    # 'mean' denominator for loss_accel
    pos_scale = float(w_pos) / float(n_pos)
    accel_scale = float(w_accel) / float(n_accel)

    # Lane-dense view: fold L into the lane axis (free contiguous reshape).
    lc = L * C
    d2 = denoise.reshape(B, lc)
    g2 = gt.reshape(B, lc)

    itemsize = jnp.dtype(denoise.dtype).itemsize
    tb = _choose_batch_tile(B, lc * itemsize)
    grid = (B // tb,)

    # 2 inputs x 2 pipeline buffers + f32 intermediates + headroom.
    tile_in_bytes = tb * lc * itemsize
    vmem_est = 2 * 2 * tile_in_bytes + 6 * tb * lc * 4 + (1 << 20)
    vmem_limit = int(min(max(vmem_est, 32 << 20), 64 << 20))

    kernel = functools.partial(
        _smoothnet_loss_kernel,
        seq_len=L, channels=C,
        pos_scale=pos_scale, accel_scale=accel_scale,
    )

    cost = pl.CostEstimate(
        flops=8 * B * L * C,
        transcendentals=0,
        bytes_accessed=2 * B * L * C * itemsize + 4,
    )

    out = pl.pallas_call(
        kernel,
        out_shape=jax.ShapeDtypeStruct((1, 1), jnp.float32),
        grid_spec=pltpu.PrefetchScalarGridSpec(
            num_scalar_prefetch=0,
            grid=grid,
            in_specs=[
                pl.BlockSpec((tb, lc), lambda i: (i, 0)),
                pl.BlockSpec((tb, lc), lambda i: (i, 0)),
            ],
            out_specs=pl.BlockSpec((1, 1), lambda i: (0, 0),
                                   memory_space=pltpu.SMEM),
        ),
        compiler_params=pltpu.CompilerParams(
            dimension_semantics=("arbitrary",),
            vmem_limit_bytes=vmem_limit,
        ),
        cost_estimate=cost,
    )(d2, g2)
    return out[0, 0]


def smoothnet_loss_ref(denoise, gt, *, w_accel, w_pos):
    """Pure-JAX reference mirroring the PyTorch forward."""
    d = jnp.transpose(denoise, (0, 2, 1)).astype(jnp.float32)  # (B, C, L)
    g = jnp.transpose(gt, (0, 2, 1)).astype(jnp.float32)
    loss_pos = jnp.mean(jnp.abs(d - g))
    accel_g = g[:, :, :-2] - 2 * g[:, :, 1:-1] + g[:, :, 2:]
    accel_d = d[:, :, :-2] - 2 * d[:, :, 1:-1] + d[:, :, 2:]
    loss_accel = jnp.mean(jnp.abs(accel_d - accel_g))
    return w_accel * loss_accel + w_pos * loss_pos


if __name__ == "__main__":
    # Deterministic "parameters" of the module (constructor args).
    w_accel = 1.0
    w_pos = 0.5

    # Small shapes: batch=2, seq=8, channels=32  -> (B, L, C)
    B, L, C = 2, 8, 32
    key = jax.random.PRNGKey(0)
    k1, k2 = jax.random.split(key)
    denoise = jax.random.normal(k1, (B, L, C), dtype=jnp.float32)
    gt = jax.random.normal(k2, (B, L, C), dtype=jnp.float32)

    loss = smoothnet_loss(denoise, gt, w_accel=w_accel, w_pos=w_pos)
    loss = jax.block_until_ready(loss)

    ref = jax.block_until_ready(
        smoothnet_loss_ref(denoise, gt, w_accel=w_accel, w_pos=w_pos))
    assert jnp.allclose(loss, ref, rtol=1e-5, atol=1e-5), (loss, ref)

    print("KERNEL_OK")
</pallas_src>

<mosaic_0001>
module attributes {stable_mosaic.version = 11 : i64} {
  func.func @_smoothnet_loss_kernel(%arg0: i32, %arg1: memref<2x256xf32, #tpu.memory_space<vmem>>, %arg2: memref<2x256xf32, #tpu.memory_space<vmem>>, %arg3: memref<1x1xf32, #tpu.memory_space<smem>>) attributes {dimension_semantics = [#tpu.dimension_semantics<arbitrary>], iteration_bounds = array<i64: 1>, scalar_prefetch = 0 : i64, scratch_operands = 0 : i64, tpu.core_type = #tpu.core_type<tc>, window_params = [{transform_indices = @transform_0, window_bounds = array<i64: 2, 256>}, {transform_indices = @transform_1, window_bounds = array<i64: 2, 256>}, {transform_indices = @transform_2, window_bounds = array<i64: 1, 1>}]} {
    %c0_i32 = arith.constant 0 : i32
    %0 = arith.cmpi eq, %arg0, %c0_i32 : i32
    %1 = arith.extui %0 : i1 to i32
    %c0_i32_0 = arith.constant 0 : i32
    %2 = arith.cmpi ne, %1, %c0_i32_0 : i32
    scf.if %2 {
      %cst_13 = arith.constant 0.000000e+00 : f32
      %c0_14 = arith.constant 0 : index
      %c0_15 = arith.constant 0 : index
      %31 = memref.load %arg3[%c0_14, %c0_15] : memref<1x1xf32, #tpu.memory_space<smem>>
      memref.store %cst_13, %arg3[%c0_14, %c0_15] : memref<1x1xf32, #tpu.memory_space<smem>>
    } else {
    }
    %c0 = arith.constant 0 : index
    %c0_1 = arith.constant 0 : index
    %3 = vector.load %arg1[%c0, %c0_1] : memref<2x256xf32, #tpu.memory_space<vmem>>, vector<2x256xf32>
    %c0_2 = arith.constant 0 : index
    %c0_3 = arith.constant 0 : index
    %4 = vector.load %arg2[%c0_2, %c0_3] : memref<2x256xf32, #tpu.memory_space<vmem>>, vector<2x256xf32>
    %5 = arith.subf %3, %4 : vector<2x256xf32>
    %6 = math.absf %5 : vector<2x256xf32>
    %7 = vector.shape_cast %6 : vector<2x256xf32> to vector<1x2x256xf32>
    %cst = arith.constant dense<0.000000e+00> : vector<1xf32>
    %8 = vector.multi_reduction <add>, %7, %cst [1, 2] : vector<1x2x256xf32> to vector<1xf32>
    %9 = vector.shape_cast %8 : vector<1xf32> to vector<1x1x1xf32>
    %10 = vector.extract %9[0, 0, 0] : f32 from vector<1x1x1xf32>
    %c224_i32 = arith.constant 224 : i32
    %11 = tpu.dynamic_rotate %5 by %c224_i32 dim 1 : vector<2x256xf32>, i32 -> vector<2x256xf32>
    %12 = arith.subf %5, %11 : vector<2x256xf32>
    %c224_i32_4 = arith.constant 224 : i32
    %13 = tpu.dynamic_rotate %12 by %c224_i32_4 dim 1 : vector<2x256xf32>, i32 -> vector<2x256xf32>
    %14 = arith.subf %12, %13 : vector<2x256xf32>
    %15 = tpu.iota {dimensions = array<i32: 1>} : vector<2x256xi32>
    %c192_i32 = arith.constant 192 : i32
    %16 = vector.broadcast %c192_i32 : i32 to vector<2x256xi32>
    %17 = arith.cmpi slt, %15, %16 : vector<2x256xi32>
    %18 = math.absf %14 : vector<2x256xf32>
    %cst_5 = arith.constant 0.000000e+00 : f32
    %19 = vector.broadcast %cst_5 : f32 to vector<2x256xf32>
    %20 = arith.select %17, %18, %19 : vector<2x256xi1>, vector<2x256xf32>
    %21 = vector.shape_cast %20 : vector<2x256xf32> to vector<1x2x256xf32>
    %cst_6 = arith.constant dense<0.000000e+00> : vector<1xf32>
    %22 = vector.multi_reduction <add>, %21, %cst_6 [1, 2] : vector<1x2x256xf32> to vector<1xf32>
    %23 = vector.shape_cast %22 : vector<1xf32> to vector<1x1x1xf32>
    %24 = vector.extract %23[0, 0, 0] : f32 from vector<1x1x1xf32>
    %c0_7 = arith.constant 0 : index
    %c0_8 = arith.constant 0 : index
    %25 = memref.load %arg3[%c0_7, %c0_8] : memref<1x1xf32, #tpu.memory_space<smem>>
    %cst_9 = arith.constant 9.765625E-4 : f32
    %26 = arith.mulf %cst_9, %10 : f32
    %cst_10 = arith.constant 0.00260416674 : f32
    %27 = arith.mulf %cst_10, %24 : f32
    %28 = arith.addf %26, %27 : f32
    %29 = arith.addf %25, %28 : f32
    %c0_11 = arith.constant 0 : index
    %c0_12 = arith.constant 0 : index
    %30 = memref.load %arg3[%c0_11, %c0_12] : memref<1x1xf32, #tpu.memory_space<smem>>
    memref.store %29, %arg3[%c0_11, %c0_12] : memref<1x1xf32, #tpu.memory_space<smem>>
    return
  }
  func.func @transform_0(%arg0: i32) -> (i32, i32) {
    %c0_i32 = arith.constant 0 : i32
    %c0_i32_0 = arith.constant 0 : i32
    return %arg0, %c0_i32 : i32, i32
  }
  func.func @transform_1(%arg0: i32) -> (i32, i32) {
    %c0_i32 = arith.constant 0 : i32
    %c0_i32_0 = arith.constant 0 : i32
    return %arg0, %c0_i32 : i32, i32
  }
  func.func @transform_2(%arg0: i32) -> (i32, i32) {
    %c0_i32 = arith.constant 0 : i32
    %c0_i32_0 = arith.constant 0 : i32
    %c0_i32_1 = arith.constant 0 : i32
    return %c0_i32, %c0_i32_0 : i32, i32
  }
}

</mosaic_0001>

<bundles_post_ra>
// kernel: tpu_custom_call.1
= control target key start
LH: loop header
LB: loop body
LE: loop exit
PB: predicated region body
PF: predicated region fallthrough
CT: control target
= control target key end

     0   :  { %7 = vsyncpa [#allocation3], 0  ;;  %s283_s0 = inlined_call_operand.hbm [shape: f32[2,256], index: 0, kind: input, shape index: {}]   ;;  %s284_s1 = inlined_call_operand.hbm [shape: f32[2,256], index: 1, kind: input, shape index: {}]   ;;  %s285_s2 = inlined_call_operand.hbm [shape: f32[1,1], index: 2, kind: output, shape index: {}]  }
   0x1   :  { %8 = vsyncpa [#allocation6], 0 }
   0x2   :  { %9 = vsyncpa [#allocation4], 0  ;;  %s246_s9 = smov [#allocation2]   ;;  %s247_s11 = smov [#allocation5]  }
   0x3   :  { %s16_s10 = sshll.u32 %s246_s9, 4  ;;  %s26_s12 = sshll.u32 %s247_s11, 4  ;;  %s17_s10 = int_to_ptr.vmem [resolvable:$true] %s16_s10  ;;  %s27_s12 = int_to_ptr.vmem [resolvable:$true] %s26_s12 }
   0x4   :  { %s200_s13 = scalar_lea.vmem %s17_s10, 64  ;;  %p205_p1 = scmp.lt.s32.totalorder %s17_s10, %s17_s10 }
   0x5   :  { %p201_p0 = scmp.ne.s32.totalorder %s17_s10, %s200_s13  ;;  %p206_p2 = scmp.lt.s32.totalorder %s200_s13, %s200_s13 }
   0x7   :  { %p207_p3 = por %p206_p2, %p205_p1 }
   0x9   :  { %p208_p4 = pnand %p207_p3, %p201_p0 }
   0xb   :  { %211 = shalt.err (!%p208_p4)
}
   0xc   :  { %19 = dma.hbm_to_vmem [thread:$0]  %s283_s0, 64, %s17_s10, [#allocation3]  }
   0xd   :  { %s220_s16 = scalar_lea.vmem %s27_s12, 64  ;;  %p225_p6 = scmp.lt.s32.totalorder %s27_s12, %s27_s12 }
   0xe   :  { %p221_p5 = scmp.ne.s32.totalorder %s27_s12, %s220_s16  ;;  %p226_p7 = scmp.lt.s32.totalorder %s220_s16, %s220_s16 }
  0x10   :  { %p227_p8 = por %p226_p7, %p225_p6 }
  0x12   :  { %p228_p9 = pnand %p227_p8, %p221_p5 }
  0x14   :  { %231 = shalt.err (!%p228_p9)
}
  0x15   :  { %29 = dma.hbm_to_vmem [thread:$0]  %s284_s1, 64, %s27_s12, [#allocation6]  }
  0x16   :  { %240 = dma.done.wait [#allocation3], 64  }
  0x17   :  { %241 = vsyncadd [#allocation3], 4294967232 }
  0x18   :  { %242 = dma.done.wait [#allocation6], 64  }
  0x19   :  { %243 = vsyncadd [#allocation6], 4294967232  ;;  %v50_v0 = vlaneseq  ;;  %v248_v1 = vmov 1983009808   ;;  %v42_v6 = vld [vmem:[#allocation2] sm:$0xf] }
  0x1a   :  { %v48_v2 = vunpack.c.l.s4 %v248_v1  ;;  %v43_v7 = vld [vmem:[#allocation5] sm:$0xf]  ;;  %s249_s0 = smov 96   ;;  %vm57_vm1 = vcmask 1041408   ;;  %s250_s23 = smov [#allocation7]  }
  0x1b   :  { %v51_v3 = vshrl.u32 %v50_v0, 7  ;;  %v44_v8 = vsub.f32 %v42_v6, %v43_v7  ;;  %v86_v11 = vand.u32 127, %v50_v0 }
  0x1c   :  { %v49_v4 = vunpack.c.0.s8 %v48_v2 }
  0x1d   :  { %vm87_vm0 = vcmp.lt.s32.totalorder %v86_v11, 96  ;;  %v45_v17 = vand.u32 2147483647, %v44_v8  ;;  %v131_v34 = vadd.s32 128, %v86_v11 }
  0x1e   :  { %v52_v5 = vsub.s32 %v49_v4, %v51_v3 }
  0x1f   :  { %vm133_vm2 = vcmp.lt.s32.totalorder %v131_v34, 192 }
  0x20   :  { %v77_v9 = vrot.slane %v44_v8, %v52_v5  ;;  %v53_v19 = vrot.slane %v45_v17, %v52_v5 }
  0x22   :  { %81 = vrot.lane.b32.xlu0 %v77_v9, %s249_s0  ;;  %v78_v10 = vcombine.high %v77_v9, %v77_v9  ;;  %v54_v21 = vcombine.high %v53_v19, %v53_v19  ;;  %v58_v22 = vsel %vm57_vm1, %v53_v19, 0.0 }
  0x24   :  { %v59_v24 = vsel %vm57_vm1, %v54_v21, 0.0 }
  0x25   :  { %v60_v25 = vadd.f32 %v59_v24, %v58_v22 }
  0x26   :  { %83 = vrot.lane.b32.xlu0 %v78_v10, %s249_s0 }
  0x45   :  { %61 = vadd.xlane.f32.xlu0 %v60_v25 }
  0x94   :  { %v82_v12 = vpop.permute.xlu0 %81 }
  0x98   :  { %v84_v13 = vpop.permute.xlu0 %83 }
  0x99   :  { %v88_v14 = vsel %vm87_vm0, %v82_v12, %v84_v13  ;;  %v89_v15 = vsel %vm87_vm0, %v84_v13, %v82_v12 }
  0x9a   :  { %v92_v16 = vcombine.low %v88_v14, %v89_v15 }
  0x9c   :  { %v99_v18 = vrot.slane %v92_v16, %v52_v5 }
  0x9e   :  { %v101_v20 = vsub.f32 %v44_v8, %v99_v18 }
  0xa0   :  { %v109_v23 = vrot.slane %v101_v20, %v52_v5 }
  0xa2   :  { %113 = vrot.lane.b32.xlu1 %v109_v23, %s249_s0  ;;  %v110_v26 = vcombine.high %v109_v23, %v109_v23 }
  0xa6   :  { %115 = vrot.lane.b32.xlu1 %v110_v26, %s249_s0 }
  0xce   :  { %v62_v42 = vpop.xlane.xlu0 %61 }
  0xcf   :  { %v63_v43 = vrot.slane %v62_v42, 4 }
  0xd1   :  { %v64_v44 = vadd.f32 %v63_v43, %v62_v42 }
  0xd3   :  { %v65_v45 = vrot.slane %v64_v44, 2 }
  0xd5   :  { %v66_v46 = vadd.f32 %v65_v45, %v64_v44 }
  0xd7   :  { %v67_v47 = vrot.slane %v66_v46, 1 }
  0xd9   :  { %v68_v48 = vadd.f32 %v67_v47, %v66_v46 }
  0xdb   :  { %182 = vpush %v68_v48 }
 0x10c   :  { %s183_s1 = spop %182 }
 0x10d   :  { %s161_s19 = smul.f32 0.0009765625, %s183_s1 }
 0x114   :  { %v114_v27 = vpop.permute.xlu1 %113 }
 0x118   :  { %v116_v28 = vpop.permute.xlu1 %115 }
 0x119   :  { %v117_v29 = vsel %vm87_vm0, %v114_v27, %v116_v28  ;;  %v118_v30 = vsel %vm87_vm0, %v116_v28, %v114_v27 }
 0x11a   :  { %v121_v31 = vcombine.low %v117_v29, %v118_v30 }
 0x11c   :  { %v128_v32 = vrot.slane %v121_v31, %v52_v5 }
 0x11e   :  { %v130_v33 = vsub.f32 %v101_v20, %v128_v32 }
 0x120   :  { %v134_v35 = vand.u32 2147483647, %v130_v33 }
 0x122   :  { %v142_v36 = vrot.slane %v134_v35, %v52_v5 }
 0x124   :  { %v143_v37 = vcombine.high %v142_v36, %v142_v36  ;;  %v148_v39 = vsel %vm57_vm1, %v142_v36, 0.0 }
 0x126   :  { %v147_v38 = vsel %vm133_vm2, %v143_v37, 0.0 }
 0x127   :  { %v149_v40 = vsel %vm57_vm1, %v147_v38, 0.0 }
 0x128   :  { %v150_v41 = vadd.f32 %v149_v40, %v148_v39 }
 0x12a   :  { %151 = vadd.xlane.f32.xlu1 %v150_v41 }
 0x1b3   :  { %v152_v49 = vpop.xlane.xlu1 %151 }
 0x1b4   :  { %v153_v50 = vrot.slane %v152_v49, 4 }
 0x1b6   :  { %v154_v51 = vadd.f32 %v153_v50, %v152_v49 }
 0x1b8   :  { %v155_v52 = vrot.slane %v154_v51, 2 }
 0x1ba   :  { %v156_v53 = vadd.f32 %v155_v52, %v154_v51 }
 0x1bc   :  { %v157_v54 = vrot.slane %v156_v53, 1 }
 0x1be   :  { %v158_v55 = vadd.f32 %v157_v54, %v156_v53 }
 0x1c0   :  { %184 = vpush %v158_v55 }
 0x1f1   :  { %s185_s20 = spop %184 }
 0x1f2   :  { %s162_s21 = smul.f32 0.0026041667, %s185_s20 }
 0x1f4   :  { %s163_s22 = sadd.f32 %s162_s21, %s161_s19 }
 0x1f6   :  { %166 = sst [smem:[#allocation7]] %s163_s22 }
 0x1f7   :  { %174 = dma.smem_to_hbm %s250_s23, 16, %s285_s2, [#allocation4]  }
 0x1f8   :  { %244 = dma.done.wait [#allocation4], 16  }
 0x1f9   :  { %245 = vsyncadd [#allocation4], 4294967280 }
 0x1fa   :  { %178 = sfence }
 0x1fb   :  { %179 = vsyncpa [#allocation3], 1 }
 0x1fc   :  { %180 = vsyncpa [#allocation6], 1 }
 0x1fd   :  { %181 = vsyncpa [#allocation4], 1 }

</bundles_post_ra>
